<compile_context>
chip_gen: v6e
topology: v6e:2x2x1
jax: 0.10.0
libtpu: 0.0.40
codegen_flags: <defaults>
</compile_context>

<pallas_src>
import functools

import jax
import jax.numpy as jnp
from jax import lax
from jax.experimental import pallas as pl
from jax.experimental.pallas import tpu as pltpu


def _round_up(x, m):
    return ((x + m - 1) // m) * m


def _pick_tile(dim, candidates):
    for t in candidates:
        if t <= dim and dim % t == 0:
            return t
    return 128


# --------------------------------------------------------------------------
# Kernel 1 (prep): degree reduction over int8 A + H_in @ W + row scalings.
#   X = d * (H_in @ W)   (bf16)      d = rsqrt(deg + 1)   (f32)
#   S = H_skip @ W_skip  (f32, only when skip=True)
# --------------------------------------------------------------------------
def _make_prep_kernel(skip: bool, tk: int):
    n_groups = tk // 128

    def kernel(*refs):
        if skip:
            a_ref, h_ref, w_ref, hs_ref, ws_ref, x_ref, d_ref, s_ref, deg_acc = refs
        else:
            a_ref, h_ref, w_ref, x_ref, d_ref, deg_acc = refs

        k = pl.program_id(1)

        @pl.when(k == 0)
        def _init():
            deg_acc[...] = jnp.zeros_like(deg_acc)

        # int8 -> f32 cast + lane-group adds (pure VPU, hides under the A DMA);
        # the expensive cross-lane reduce is deferred to the k==last epilogue.
        a = a_ref[...].astype(jnp.float32)                 # (Tm, Tk)
        part = a[:, 0:128]
        for g in range(1, n_groups):                        # lane-aligned slices
            part = part + a[:, g * 128:(g + 1) * 128]
        deg_acc[...] += part

        @pl.when(k == pl.num_programs(1) - 1)
        def _fin():
            deg = jnp.sum(deg_acc[...], axis=1, keepdims=True) + 1.0  # +1 = self loop
            d = lax.rsqrt(deg)                                        # (Tm, 1)
            hw = jnp.dot(h_ref[...], w_ref[...],
                         preferred_element_type=jnp.float32)          # (Tm, Fp)
            x_ref[...] = (d * hw).astype(x_ref.dtype)
            d_ref[...] = d
            if skip:
                s_ref[...] = jnp.dot(hs_ref[...], ws_ref[...],
                                     preferred_element_type=jnp.float32)

    return kernel


# --------------------------------------------------------------------------
# Kernel 2 (main): out = act( d * (A @ X + X) + S )
#   A int8 tile -> bf16 cast -> MXU dot against VMEM-resident bf16 X;
#   f32 accumulation directly into the resident output block; fused epilogue.
# --------------------------------------------------------------------------
def _make_main_kernel(activation: str, f_out: int, tm: int, tk: int,
                      skip: bool, x_resident: bool):
    def kernel(*refs):
        a_ref, x_ref, d_ref = refs[0], refs[1], refs[2]
        idx = 3
        if not x_resident:
            xrow_ref = refs[idx]; idx += 1
        if skip:
            s_ref = refs[idx]; idx += 1
        o_ref = refs[idx]

        i = pl.program_id(0)
        k = pl.program_id(1)

        @pl.when(k == 0)
        def _init():
            o_ref[...] = jnp.zeros_like(o_ref)

        a = a_ref[...].astype(jnp.bfloat16)                # int8 -> bf16 (exact 0/1)
        if x_resident:
            xk = x_ref[pl.ds(pl.multiple_of(k * tk, tk), tk), :]
        else:
            xk = x_ref[...]
        o_ref[...] += jnp.dot(a, xk, preferred_element_type=jnp.float32)

        @pl.when(k == pl.num_programs(1) - 1)
        def _fin():
            if x_resident:
                xi = x_ref[pl.ds(pl.multiple_of(i * tm, tm), tm), :]
            else:
                xi = xrow_ref[...]
            # self-loop term folded in: d*(A@X) + d^2*HW == d*(A@X + X)
            h = d_ref[...] * (o_ref[...] + xi.astype(jnp.float32))
            if skip:
                h = h + s_ref[...]
            if activation == "relu":
                out = jnp.maximum(h, 0.0)
            else:  # softmax over features; mask lanes padded beyond F_out
                col = lax.broadcasted_iota(jnp.int32, h.shape, 1)
                h = jnp.where(col < f_out, h, -1e30)
                m = jnp.max(h, axis=1, keepdims=True)
                e = jnp.exp(h - m)
                out = e / jnp.sum(e, axis=1, keepdims=True)
            o_ref[...] = out.astype(o_ref.dtype)

    return kernel


# --------------------------------------------------------------------------
# Wrapper
# --------------------------------------------------------------------------
@functools.partial(jax.jit, static_argnames=("activation", "skip"))
def graph_conv(A, H_in, W, H_skip_in=None, W_skip=None,
               activation="relu", skip=False):
    """Pallas-backed GraphConv forward.  A:[N,N], H_in:[N,Fin], W:[Fin,Fout]."""
    if activation not in ("relu", "softmax"):
        raise ValueError("activations supported are 'relu' and 'softmax'")
    if skip and (H_skip_in is None or W_skip is None):
        raise ValueError("pass the skip-connection inputs when skip=True")

    f32 = jnp.float32
    N = A.shape[0]
    F_in, F_out = W.shape
    Np = _round_up(N, 128)                      # pad node dim to a lane multiple
    Fp = _round_up(F_out, 128)                  # lane-dense output / matmul width
    Tm = _pick_tile(Np, (512, 256, 128))        # output-row tile
    Tk = _pick_tile(Np, (2048, 1024, 512, 256, 128))   # contraction tile
    grid = (Np // Tm, Np // Tk)

    # X (Np, Fp) bf16 held fully resident in VMEM when small enough.
    x_resident = Np * Fp * 2 <= 6 * 1024 * 1024

    # Zero-padding keeps the math exact: padded A rows get deg = 0 + 1 = 1,
    # padded columns contribute nothing, padded feature lanes are zero.
    # Cast to int8 BEFORE padding so no f32 NxN intermediate is materialized.
    A_p = jnp.pad(A.astype(jnp.int8), ((0, Np - N), (0, Np - N)))
    H_p = jnp.pad(H_in.astype(f32), ((0, Np - N), (0, 0)))
    W_p = jnp.pad(W.astype(f32), ((0, 0), (0, Fp - F_out)))

    cparams = pltpu.CompilerParams(
        dimension_semantics=("parallel", "arbitrary"),   # i: megacore, k: reduction
        vmem_limit_bytes=48 * 1024 * 1024)

    # --- prep pass ------------------------------------------------------
    if grid[0] * grid[1] >= 4:                  # pure-stream pass: deeper A buffering
        a_prep_spec = pl.BlockSpec((Tm, Tk), lambda i, k: (i, k),
                                   pipeline_mode=pl.Buffered(3))
    else:
        a_prep_spec = pl.BlockSpec((Tm, Tk), lambda i, k: (i, k))

    prep_inputs = [A_p, H_p, W_p]
    prep_specs = [
        a_prep_spec,                                        # A int8 tile
        pl.BlockSpec((Tm, F_in), lambda i, k: (i, 0)),      # H_in row block (resident over k)
        pl.BlockSpec((F_in, Fp), lambda i, k: (0, 0)),      # W (resident)
    ]
    prep_out_specs = [
        pl.BlockSpec((Tm, Fp), lambda i, k: (i, 0)),        # X (bf16)
        pl.BlockSpec((Tm, 1), lambda i, k: (i, 0)),         # d
    ]
    prep_out_shape = [
        jax.ShapeDtypeStruct((Np, Fp), jnp.bfloat16),
        jax.ShapeDtypeStruct((Np, 1), f32),
    ]
    if skip:
        F_skip = W_skip.shape[0]
        Hs_p = jnp.pad(H_skip_in.astype(f32), ((0, Np - N), (0, 0)))
        Ws_p = jnp.pad(W_skip.astype(f32), ((0, 0), (0, Fp - F_out)))
        prep_inputs += [Hs_p, Ws_p]
        prep_specs += [
            pl.BlockSpec((Tm, F_skip), lambda i, k: (i, 0)),
            pl.BlockSpec((F_skip, Fp), lambda i, k: (0, 0)),
        ]
        prep_out_specs.append(pl.BlockSpec((Tm, Fp), lambda i, k: (i, 0)))
        prep_out_shape.append(jax.ShapeDtypeStruct((Np, Fp), f32))

    prep_cost = pl.CostEstimate(
        flops=int(Np * Np + 2 * Np * F_in * Fp
                  + (2 * Np * W_skip.shape[0] * Fp if skip else 0)),
        transcendentals=int(Np),
        bytes_accessed=int(Np * Np * 1 + Np * F_in * 4 + F_in * Fp * 4
                           + Np * Fp * 2 + Np * 4),
    )

    prep_outs = pl.pallas_call(
        _make_prep_kernel(skip, Tk),
        grid=grid,
        in_specs=prep_specs,
        out_specs=prep_out_specs,
        out_shape=prep_out_shape,
        scratch_shapes=[pltpu.VMEM((Tm, 128), f32)],        # degree partials
        compiler_params=cparams,
        cost_estimate=prep_cost,
    )(*prep_inputs)

    if skip:
        X, d, S = prep_outs
    else:
        X, d = prep_outs

    # --- main pass: A @ X with fused epilogue ----------------------------
    main_inputs = [A_p, X, d]
    if x_resident:
        x_spec = pl.BlockSpec((Np, Fp), lambda i, k: (0, 0))   # whole X resident in VMEM
    else:
        x_spec = pl.BlockSpec((Tk, Fp), lambda i, k: (k, 0))   # streamed fallback
    main_specs = [
        pl.BlockSpec((Tm, Tk), lambda i, k: (i, k)),           # A int8 tile
        x_spec,
        pl.BlockSpec((Tm, 1), lambda i, k: (i, 0)),            # d row block (resident over k)
    ]
    if not x_resident:
        main_inputs.append(X)                                  # X row block for the epilogue
        main_specs.append(pl.BlockSpec((Tm, Fp), lambda i, k: (i, 0)))
    if skip:
        main_inputs.append(S)
        main_specs.append(pl.BlockSpec((Tm, Fp), lambda i, k: (i, 0)))

    main_cost = pl.CostEstimate(
        flops=int(2 * Np * Np * Fp + 4 * Np * Fp),
        transcendentals=int(Np * Fp if activation == "softmax" else 0),
        bytes_accessed=int(Np * Np * 1 + Np * Fp * 2 + Np * Fp * 4 + Np * 4),
    )

    out_p = pl.pallas_call(
        _make_main_kernel(activation, F_out, Tm, Tk, skip, x_resident),
        grid=grid,
        in_specs=main_specs,
        out_specs=pl.BlockSpec((Tm, Fp), lambda i, k: (i, 0)),  # f32, accumulated in place
        out_shape=jax.ShapeDtypeStruct((Np, Fp), f32),
        compiler_params=cparams,
        cost_estimate=main_cost,
    )(*main_inputs)

    return out_p[:N, :F_out]


# --------------------------------------------------------------------------
# Reference / demo
# --------------------------------------------------------------------------
def _xavier_uniform(key, fan_in, fan_out, dtype=jnp.float32):
    bound = (6.0 / (fan_in + fan_out)) ** 0.5
    return jax.random.uniform(key, (fan_in, fan_out), dtype=dtype,
                              minval=-bound, maxval=bound)


def _reference(A, H_in, W, H_skip_in=None, W_skip=None, activation="relu"):
    """Pure-JAX reference mirroring the PyTorch forward (float32)."""
    N = A.shape[0]
    A_ = A + jnp.eye(N, dtype=A.dtype)
    deg = jnp.sum(A_, axis=1)
    d_root_inv = 1.0 / jnp.sqrt(deg)
    A_norm = d_root_inv[:, None] * A_ * d_root_inv[None, :]
    H_out = A_norm @ H_in @ W
    if H_skip_in is not None:
        H_out = H_out + H_skip_in @ W_skip
    if activation == "relu":
        return jnp.maximum(H_out, 0.0)
    return jax.nn.softmax(H_out, axis=1)


if __name__ == "__main__":
    key = jax.random.PRNGKey(0)
    k_a, k_h, k_w, k_hs, k_ws = jax.random.split(key, 5)

    N, F_in, F_out, F_skip = 16, 32, 8, 24

    # Symmetric 0/1 adjacency, no self loops (kernel adds the +I term itself)
    A_rand = jax.random.uniform(k_a, (N, N), dtype=jnp.float32)
    A = (A_rand > 0.7).astype(jnp.float32)
    A = jnp.maximum(A, A.T) * (1.0 - jnp.eye(N, dtype=jnp.float32))

    H_in = jax.random.normal(k_h, (N, F_in), dtype=jnp.float32)
    W = _xavier_uniform(k_w, F_in, F_out)
    H_skip = jax.random.normal(k_hs, (N, F_skip), dtype=jnp.float32)
    W_skip = _xavier_uniform(k_ws, F_skip, F_out)

    # Tolerances account for bf16 X / bf16 MXU operands (the PyTorch reference
    # is float64, so exact parity is impossible on TPU anyway).
    TOL = dict(atol=3e-2, rtol=3e-2)

    # relu, no skip
    out = jax.block_until_ready(graph_conv(A, H_in, W, activation="relu"))
    ref = _reference(A, H_in, W, activation="relu")
    assert out.shape == (N, F_out)
    assert jnp.allclose(out, ref, **TOL), "relu mismatch"

    # relu, with skip connection
    out_s = jax.block_until_ready(
        graph_conv(A, H_in, W, H_skip, W_skip, activation="relu", skip=True))
    ref_s = _reference(A, H_in, W, H_skip, W_skip, activation="relu")
    assert jnp.allclose(out_s, ref_s, **TOL), "skip mismatch"

    # softmax (exact division in the epilogue; runs once per i-block)
    out_sm = jax.block_until_ready(graph_conv(A, H_in, W, activation="softmax"))
    ref_sm = _reference(A, H_in, W, activation="softmax")
    assert jnp.allclose(out_sm, ref_sm, **TOL), "softmax mismatch"

    print("KERNEL_OK")
</pallas_src>

<mosaic_0001>
module attributes {stable_mosaic.version = 11 : i64} {
  func.func @kernel(%arg0: i32, %arg1: i32, %arg2: memref<128x128xi8, #tpu.memory_space<vmem>>, %arg3: memref<128x32xf32, #tpu.memory_space<vmem>>, %arg4: memref<32x128xf32, #tpu.memory_space<vmem>>, %arg5: memref<128x128xbf16, #tpu.memory_space<vmem>>, %arg6: memref<128x1xf32, #tpu.memory_space<vmem>>, %arg7: memref<128x128xf32, #tpu.memory_space<vmem>>) attributes {dimension_semantics = [#tpu.dimension_semantics<parallel>, #tpu.dimension_semantics<arbitrary>], iteration_bounds = array<i64: 1, 1>, scalar_prefetch = 0 : i64, scratch_operands = 1 : i64, tpu.core_type = #tpu.core_type<tc>, window_params = [{transform_indices = @transform_0, window_bounds = array<i64: 128, 128>}, {transform_indices = @transform_1, window_bounds = array<i64: 128, 32>}, {pipeline_mode = #tpu.pipeline_mode<synchronous>, transform_indices = @transform_2, window_bounds = array<i64: 32, 128>}, {transform_indices = @transform_3, window_bounds = array<i64: 128, 128>}, {transform_indices = @transform_4, window_bounds = array<i64: 128, 1>}]} {
    %c0_i32 = arith.constant 0 : i32
    %0 = arith.cmpi eq, %arg1, %c0_i32 : i32
    %1 = arith.extui %0 : i1 to i32
    %c0_i32_0 = arith.constant 0 : i32
    %2 = arith.cmpi ne, %1, %c0_i32_0 : i32
    scf.if %2 {
      %cst = arith.constant 0.000000e+00 : f32
      %11 = vector.broadcast %cst : f32 to vector<128x128xf32>
      %c0_8 = arith.constant 0 : index
      %c0_9 = arith.constant 0 : index
      %12 = vector.load %arg7[%c0_8, %c0_9] : memref<128x128xf32, #tpu.memory_space<vmem>>, vector<128x128xf32>
      tpu.vector_store %arg7[%c0_8, %c0_9], %11 {strides = array<i32>} : memref<128x128xf32, #tpu.memory_space<vmem>>, vector<128x128xf32>,
    } else {
    }
    %c0 = arith.constant 0 : index
    %c0_1 = arith.constant 0 : index
    %3 = vector.load %arg2[%c0, %c0_1] : memref<128x128xi8, #tpu.memory_space<vmem>>, vector<128x128xi8>
    %4 = arith.sitofp %3 : vector<128x128xi8> to vector<128x128xf32>
    %c0_2 = arith.constant 0 : index
    %c0_3 = arith.constant 0 : index
    %5 = vector.load %arg7[%c0_2, %c0_3] : memref<128x128xf32, #tpu.memory_space<vmem>>, vector<128x128xf32>
    %6 = arith.addf %5, %4 : vector<128x128xf32>
    %c0_4 = arith.constant 0 : index
    %c0_5 = arith.constant 0 : index
    %7 = vector.load %arg7[%c0_4, %c0_5] : memref<128x128xf32, #tpu.memory_space<vmem>>, vector<128x128xf32>
    tpu.vector_store %arg7[%c0_4, %c0_5], %6 {strides = array<i32>} : memref<128x128xf32, #tpu.memory_space<vmem>>, vector<128x128xf32>,
    %c0_i32_6 = arith.constant 0 : i32
    %8 = arith.cmpi eq, %arg1, %c0_i32_6 : i32
    %9 = arith.extui %8 : i1 to i32
    %c0_i32_7 = arith.constant 0 : i32
    %10 = arith.cmpi ne, %9, %c0_i32_7 : i32
    scf.if %10 {
      %c0_8 = arith.constant 0 : index
      %c0_9 = arith.constant 0 : index
      %11 = vector.load %arg7[%c0_8, %c0_9] : memref<128x128xf32, #tpu.memory_space<vmem>>, vector<128x128xf32>
      %cst = arith.constant dense<0.000000e+00> : vector<128xf32>
      %12 = vector.multi_reduction <add>, %11, %cst [1] : vector<128x128xf32> to vector<128xf32>
      %13 = vector.shape_cast %12 : vector<128xf32> to vector<128x1xf32>
      %cst_10 = arith.constant 1.000000e+00 : f32
      %14 = vector.broadcast %cst_10 : f32 to vector<128x1xf32>
      %15 = arith.addf %13, %14 : vector<128x1xf32>
      %16 = math.rsqrt %15 : vector<128x1xf32>
      %c0_11 = arith.constant 0 : index
      %c0_12 = arith.constant 0 : index
      %17 = vector.load %arg3[%c0_11, %c0_12] : memref<128x32xf32, #tpu.memory_space<vmem>>, vector<128x32xf32>
      %c0_13 = arith.constant 0 : index
      %c0_14 = arith.constant 0 : index
      %18 = vector.load %arg4[%c0_13, %c0_14] : memref<32x128xf32, #tpu.memory_space<vmem>>, vector<32x128xf32>
      %cst_15 = arith.constant dense<0.000000e+00> : vector<128x128xf32>
      %19 = tpu.matmul %17, %18, %cst_15 {dimension_numbers = #tpu.dot_dimension_numbers<[1], [0], [0], [1], [0, 0, 1, 1], [], []>} : vector<128x32xf32>, vector<32x128xf32>, vector<128x128xf32> -> vector<128x128xf32>
      %20 = vector.broadcast %16 : vector<128x1xf32> to vector<128x128xf32>
      %21 = arith.mulf %20, %19 : vector<128x128xf32>
      %22 = arith.truncf %21 : vector<128x128xf32> to vector<128x128xbf16>
      %c0_16 = arith.constant 0 : index
      %c0_17 = arith.constant 0 : index
      %23 = vector.load %arg5[%c0_16, %c0_17] : memref<128x128xbf16, #tpu.memory_space<vmem>>, vector<128x128xbf16>
      tpu.vector_store %arg5[%c0_16, %c0_17], %22 {strides = array<i32>} : memref<128x128xbf16, #tpu.memory_space<vmem>>, vector<128x128xbf16>,
      %c0_18 = arith.constant 0 : index
      %c0_19 = arith.constant 0 : index
      %24 = vector.load %arg6[%c0_18, %c0_19] : memref<128x1xf32, #tpu.memory_space<vmem>>, vector<128x1xf32>
      tpu.vector_store %arg6[%c0_18, %c0_19], %16 {strides = array<i32>} : memref<128x1xf32, #tpu.memory_space<vmem>>, vector<128x1xf32>,
    } else {
    }
    return
  }
  func.func @transform_0(%arg0: i32, %arg1: i32) -> (i32, i32) {
    %c0_i32 = arith.constant 0 : i32
    return %arg0, %arg1 : i32, i32
  }
  func.func @transform_1(%arg0: i32, %arg1: i32) -> (i32, i32) {
    %c0_i32 = arith.constant 0 : i32
    %c0_i32_0 = arith.constant 0 : i32
    return %arg0, %c0_i32 : i32, i32
  }
  func.func @transform_2(%arg0: i32, %arg1: i32) -> (i32, i32) {
    %c0_i32 = arith.constant 0 : i32
    %c0_i32_0 = arith.constant 0 : i32
    %c0_i32_1 = arith.constant 0 : i32
    return %c0_i32, %c0_i32_0 : i32, i32
  }
  func.func @transform_3(%arg0: i32, %arg1: i32) -> (i32, i32) {
    %c0_i32 = arith.constant 0 : i32
    %c0_i32_0 = arith.constant 0 : i32
    return %arg0, %c0_i32 : i32, i32
  }
  func.func @transform_4(%arg0: i32, %arg1: i32) -> (i32, i32) {
    %c0_i32 = arith.constant 0 : i32
    %c0_i32_0 = arith.constant 0 : i32
    return %arg0, %c0_i32 : i32, i32
  }
}

module attributes {stable_mosaic.version = 11 : i64} {
  func.func @kernel(%arg0: i32, %arg1: i32, %arg2: memref<128x128xi8, #tpu.memory_space<vmem>>, %arg3: memref<128x128xbf16, #tpu.memory_space<vmem>>, %arg4: memref<128x1xf32, #tpu.memory_space<vmem>>, %arg5: memref<128x128xf32, #tpu.memory_space<vmem>>) attributes {dimension_semantics = [#tpu.dimension_semantics<parallel>, #tpu.dimension_semantics<arbitrary>], iteration_bounds = array<i64: 1, 1>, scalar_prefetch = 0 : i64, scratch_operands = 0 : i64, tpu.core_type = #tpu.core_type<tc>, window_params = [{transform_indices = @transform_0, window_bounds = array<i64: 128, 128>}, {pipeline_mode = #tpu.pipeline_mode<synchronous>, transform_indices = @transform_1, window_bounds = array<i64: 128, 128>}, {transform_indices = @transform_2, window_bounds = array<i64: 128, 1>}, {transform_indices = @transform_3, window_bounds = array<i64: 128, 128>}]} {
    %c0_i32 = arith.constant 0 : i32
    %0 = arith.cmpi eq, %arg1, %c0_i32 : i32
    %1 = arith.extui %0 : i1 to i32
    %c0_i32_0 = arith.constant 0 : i32
    %2 = arith.cmpi ne, %1, %c0_i32_0 : i32
    scf.if %2 {
      %cst_9 = arith.constant 0.000000e+00 : f32
      %16 = vector.broadcast %cst_9 : f32 to vector<128x128xf32>
      %c0_10 = arith.constant 0 : index
      %c0_11 = arith.constant 0 : index
      %17 = vector.load %arg5[%c0_10, %c0_11] : memref<128x128xf32, #tpu.memory_space<vmem>>, vector<128x128xf32>
      tpu.vector_store %arg5[%c0_10, %c0_11], %16 {strides = array<i32>} : memref<128x128xf32, #tpu.memory_space<vmem>>, vector<128x128xf32>,
    } else {
    }
    %c0 = arith.constant 0 : index
    %c0_1 = arith.constant 0 : index
    %3 = vector.load %arg2[%c0, %c0_1] : memref<128x128xi8, #tpu.memory_space<vmem>>, vector<128x128xi8>
    %4 = arith.sitofp %3 : vector<128x128xi8> to vector<128x128xbf16>
    %c128_i32 = arith.constant 128 : i32
    %5 = arith.muli %arg1, %c128_i32 : i32
    %6 = tpu.assume_multiple %5, 128 : i32
    %7 = arith.index_cast %6 : i32 to index
    %c0_2 = arith.constant 0 : index
    %8 = vector.load %arg3[%7, %c0_2] : memref<128x128xbf16, #tpu.memory_space<vmem>>, vector<128x128xbf16>
    %c0_3 = arith.constant 0 : index
    %c0_4 = arith.constant 0 : index
    %9 = vector.load %arg5[%c0_3, %c0_4] : memref<128x128xf32, #tpu.memory_space<vmem>>, vector<128x128xf32>
    %cst = arith.constant dense<0.000000e+00> : vector<128x128xf32>
    %10 = tpu.matmul %4, %8, %cst {dimension_numbers = #tpu.dot_dimension_numbers<[1], [0], [0], [1], [0, 0, 1, 1], [], []>} : vector<128x128xbf16>, vector<128x128xbf16>, vector<128x128xf32> -> vector<128x128xf32>
    %11 = arith.addf %9, %10 : vector<128x128xf32>
    %c0_5 = arith.constant 0 : index
    %c0_6 = arith.constant 0 : index
    %12 = vector.load %arg5[%c0_5, %c0_6] : memref<128x128xf32, #tpu.memory_space<vmem>>, vector<128x128xf32>
    tpu.vector_store %arg5[%c0_5, %c0_6], %11 {strides = array<i32>} : memref<128x128xf32, #tpu.memory_space<vmem>>, vector<128x128xf32>,
    %c0_i32_7 = arith.constant 0 : i32
    %13 = arith.cmpi eq, %arg1, %c0_i32_7 : i32
    %14 = arith.extui %13 : i1 to i32
    %c0_i32_8 = arith.constant 0 : i32
    %15 = arith.cmpi ne, %14, %c0_i32_8 : i32
    scf.if %15 {
      %c128_i32_9 = arith.constant 128 : i32
      %16 = arith.muli %arg0, %c128_i32_9 : i32
      %17 = tpu.assume_multiple %16, 128 : i32
      %18 = arith.index_cast %17 : i32 to index
      %c0_10 = arith.constant 0 : index
      %19 = vector.load %arg3[%18, %c0_10] : memref<128x128xbf16, #tpu.memory_space<vmem>>, vector<128x128xbf16>
      %c0_11 = arith.constant 0 : index
      %c0_12 = arith.constant 0 : index
      %20 = vector.load %arg4[%c0_11, %c0_12] : memref<128x1xf32, #tpu.memory_space<vmem>>, vector<128x1xf32>
      %c0_13 = arith.constant 0 : index
      %c0_14 = arith.constant 0 : index
      %21 = vector.load %arg5[%c0_13, %c0_14] : memref<128x128xf32, #tpu.memory_space<vmem>>, vector<128x128xf32>
      %22 = arith.extf %19 : vector<128x128xbf16> to vector<128x128xf32>
      %23 = arith.addf %21, %22 : vector<128x128xf32>
      %24 = vector.broadcast %20 : vector<128x1xf32> to vector<128x128xf32>
      %25 = arith.mulf %24, %23 : vector<128x128xf32>
      %cst_15 = arith.constant 0.000000e+00 : f32
      %26 = vector.broadcast %cst_15 : f32 to vector<128x128xf32>
      %27 = arith.maximumf %25, %26 : vector<128x128xf32>
      %c0_16 = arith.constant 0 : index
      %c0_17 = arith.constant 0 : index
      %28 = vector.load %arg5[%c0_16, %c0_17] : memref<128x128xf32, #tpu.memory_space<vmem>>, vector<128x128xf32>
      tpu.vector_store %arg5[%c0_16, %c0_17], %27 {strides = array<i32>} : memref<128x128xf32, #tpu.memory_space<vmem>>, vector<128x128xf32>,
    } else {
    }
    return
  }
  func.func @transform_0(%arg0: i32, %arg1: i32) -> (i32, i32) {
    %c0_i32 = arith.constant 0 : i32
    return %arg0, %arg1 : i32, i32
  }
  func.func @transform_1(%arg0: i32, %arg1: i32) -> (i32, i32) {
    %c0_i32 = arith.constant 0 : i32
    %c0_i32_0 = arith.constant 0 : i32
    %c0_i32_1 = arith.constant 0 : i32
    return %c0_i32, %c0_i32_0 : i32, i32
  }
  func.func @transform_2(%arg0: i32, %arg1: i32) -> (i32, i32) {
    %c0_i32 = arith.constant 0 : i32
    %c0_i32_0 = arith.constant 0 : i32
    return %arg0, %c0_i32 : i32, i32
  }
  func.func @transform_3(%arg0: i32, %arg1: i32) -> (i32, i32) {
    %c0_i32 = arith.constant 0 : i32
    %c0_i32_0 = arith.constant 0 : i32
    return %arg0, %c0_i32 : i32, i32
  }
}

</mosaic_0001>

<bundles_post_ra>
// kernel: graph_conv.2
= control target key start
LH: loop header
LB: loop body
LE: loop exit
PB: predicated region body
PF: predicated region fallthrough
CT: control target
= control target key end

     0   :  { %vm223_vm0 = vcmask 261120   ;;  %vm513_vm1 = vcmask 7168   ;;  %s950_s2 = inlined_call_operand.vmem [shape: f32[32,128], index: 2, kind: input, shape index: {}]   ;;  %s951_s1 = inlined_call_operand.vmem [shape: f32[128,32], index: 1, kind: input, shape index: {}]   ;;  %s952_s0 = inlined_call_operand.vmem [shape: s8[128,128], index: 0, kind: input, shape index: {}]   ;;  %s953_s4 = inlined_call_operand.vmem [shape: f32[128,1], index: 4, kind: output, shape index: {1}]   ;;  %s954_s3 = inlined_call_operand.vmem [shape: bf16[128,128], index: 3, kind: output, shape index: {0}]  }
   0x1   :  { %v222_v0 = vld [vmem:[%s950_s2 + $0x18] sm:$0xff]  ;;  %v221_v1 = vld [vmem:[%s950_s2 + $0x10] sm:$0xff]  ;;  %v220_v2 = vld [vmem:[%s950_s2 + $0x8] sm:$0xff] }
   0x2   :  { %653 = vmatprep.subr.mxu0 %v222_v0  ;;  %685 = vmatprep.subr.mxu1 %v222_v0  ;;  %v219_v3 = vld [vmem:[%s950_s2] sm:$0xff]  ;;  %v204_v7 = vld [vmem:[%s951_s1 + $0x8] sm:$0xff]  ;;  %v205_v11 = vld [vmem:[%s951_s1 + $0x10] sm:$0xff] }
   0x3   :  { %654 = vmatpush3.msra.mxu0 %v222_v0  ;;  %689 = vmatpush3.msra.mxu1 %v222_v0  ;;  %v203_v4 = vld [vmem:[%s951_s1] sm:$0xff]  ;;  %v212_v8 = vld [vmem:[%s951_s1 + $0x48] sm:$0xff]  ;;  %v213_v12 = vld [vmem:[%s951_s1 + $0x50] sm:$0xff] }
   0x4   :  { %655 = vmatprep.subr.mxu0 %v221_v1  ;;  %686 = vmatprep.subr.mxu1 %v221_v1  ;;  %v211_v5 = vld [vmem:[%s951_s1 + $0x40] sm:$0xff]  ;;  %v37_v17 = vld [vmem:[%s952_s0 + $0x8] sm:$0xff]  ;;  %v206_v18 = vld [vmem:[%s951_s1 + $0x18] sm:$0xff] }
   0x5   :  { %656 = vmatpush3.msra.mxu0 %v221_v1  ;;  %690 = vmatpush3.msra.mxu1 %v221_v1  ;;  %v36_v6 = vld [vmem:[%s952_s0] sm:$0xff]  ;;  %v214_v19 = vld [vmem:[%s951_s1 + $0x58] sm:$0xff]  ;;  %v45_v24 = vunpack.c.1.s8 %v37_v17  ;;  %v44_v25 = vunpack.c.0.s8 %v37_v17  ;;  %v208_v26 = vld [vmem:[%s951_s1 + $0x28] sm:$0xff]  ;;  %v47_v32 = vunpack.c.3.s8 %v37_v17  ;;  %v46_v33 = vunpack.c.2.s8 %v37_v17 }
   0x6   :  { %657 = vmatprep.subr.mxu0 %v220_v2  ;;  %687 = vmatprep.subr.mxu1 %v220_v2  ;;  %v42_v9 = vunpack.c.2.s8 %v36_v6  ;;  %v40_v10 = vunpack.c.0.s8 %v36_v6  ;;  %v43_v13 = vunpack.c.3.s8 %v36_v6  ;;  %v41_v14 = vunpack.c.1.s8 %v36_v6  ;;  %v207_v20 = vld [vmem:[%s951_s1 + $0x20] sm:$0xff]  ;;  %v216_v27 = vld [vmem:[%s951_s1 + $0x68] sm:$0xff]  ;;  %v209_v28 = vld [vmem:[%s951_s1 + $0x30] sm:$0xff] }
   0x7   :  { %658 = vmatpush3.msra.mxu0 %v220_v2  ;;  %691 = vmatpush3.msra.mxu1 %v220_v2  ;;  %v215_v21 = vld [vmem:[%s951_s1 + $0x60] sm:$0xff]  ;;  %v217_v29 = vld [vmem:[%s951_s1 + $0x70] sm:$0xff]  ;;  %v61_v30 = vcvt.s32.f32 %v45_v24  ;;  %v60_v31 = vcvt.s32.f32 %v44_v25  ;;  %v210_v35 = vld [vmem:[%s951_s1 + $0x38] sm:$0xff]  ;;  %v63_v37 = vcvt.s32.f32 %v47_v32  ;;  %v62_v38 = vcvt.s32.f32 %v46_v33 }
   0x8   :  { %659 = vmatprep.subr.mxu0 %v219_v3  ;;  %688 = vmatprep.subr.mxu1 %v219_v3  ;;  %v58_v15 = vcvt.s32.f32 %v42_v9  ;;  %v56_v16 = vcvt.s32.f32 %v40_v10  ;;  %v59_v22 = vcvt.s32.f32 %v43_v13  ;;  %v57_v23 = vcvt.s32.f32 %v41_v14  ;;  %v38_v34 = vld [vmem:[%s952_s0 + $0x10] sm:$0xff]  ;;  %v218_v36 = vld [vmem:[%s951_s1 + $0x78] sm:$0xff] }
   0x9   :  { %660 = vmatpush3.msra.mxu0 %v219_v3  ;;  %692 = vmatpush3.msra.mxu1 %v219_v3  ;;  %v49_v39 = vunpack.c.1.s8 %v38_v34  ;;  %v48_v40 = vunpack.c.0.s8 %v38_v34  ;;  %v51_v43 = vunpack.c.3.s8 %v38_v34  ;;  %v50_v44 = vunpack.c.2.s8 %v38_v34  ;;  %v39_v45 = vld [vmem:[%s952_s0 + $0x18] sm:$0xff] }
   0xa   :  { %661 = vmatprep.mubr.msk.f32.mxu0 %vm223_vm0, %v203_v4  ;;  %673 = vmatprep.mubr.msk.f32.mxu1 %vm223_vm0, %v211_v5  ;;  %v53_v48 = vunpack.c.1.s8 %v39_v45  ;;  %v52_v49 = vunpack.c.0.s8 %v39_v45  ;;  %v55_v52 = vunpack.c.3.s8 %v39_v45  ;;  %v54_v53 = vunpack.c.2.s8 %v39_v45 }
   0xb   :  { %662 = vmatmul.mubr.msk.f32.vlgmr.msra.gmra.mxu0 %vm223_vm0, %v204_v7  ;;  %674 = vmatmul.mubr.msk.f32.vlgmr.msra.gmra.mxu1 %vm223_vm0, %v212_v8  ;;  %v65_v41 = vcvt.s32.f32 %v49_v39  ;;  %v64_v42 = vcvt.s32.f32 %v48_v40  ;;  %v67_v46 = vcvt.s32.f32 %v51_v43  ;;  %v66_v47 = vcvt.s32.f32 %v50_v44 }
   0xc   :  { %664 = vmatprep.mubr.msk.f32.mxu0 %vm223_vm0, %v205_v11  ;;  %676 = vmatprep.mubr.msk.f32.mxu1 %vm223_vm0, %v213_v12  ;;  %v69_v50 = vcvt.s32.f32 %v53_v48  ;;  %v68_v51 = vcvt.s32.f32 %v52_v49  ;;  %v71_v54 = vcvt.s32.f32 %v55_v52  ;;  %v70_v55 = vcvt.s32.f32 %v54_v53 }
   0xd   :  { %143 = vadd.xlane.f32.xlu1 %v58_v15  ;;  %139 = vadd.xlane.f32.xlu0 %v56_v16 }
   0xf   :  { %665 = vmatmul.mubr.msk.f32.gmra.mxu0 %vm223_vm0, %v206_v18  ;;  %677 = vmatmul.mubr.msk.f32.gmra.mxu1 %vm223_vm0, %v214_v19 }
  0x10   :  { %667 = vmatprep.mubr.msk.f32.mxu0 %vm223_vm0, %v207_v20  ;;  %679 = vmatprep.mubr.msk.f32.mxu1 %vm223_vm0, %v215_v21 }
  0x11   :  { %145 = vadd.xlane.f32.xlu1 %v59_v22  ;;  %141 = vadd.xlane.f32.xlu0 %v57_v23 }
  0x13   :  { %668 = vmatmul.mubr.msk.f32.gmra.mxu0 %vm223_vm0, %v208_v26  ;;  %680 = vmatmul.mubr.msk.f32.gmra.mxu1 %vm223_vm0, %v216_v27 }
  0x14   :  { %670 = vmatprep.mubr.msk.f32.mxu0 %vm223_vm0, %v209_v28  ;;  %682 = vmatprep.mubr.msk.f32.mxu1 %vm223_vm0, %v217_v29 }
  0x15   :  { %149 = vadd.xlane.f32.xlu1 %v61_v30  ;;  %147 = vadd.xlane.f32.xlu0 %v60_v31 }
  0x17   :  { %671 = vmatmul.mubr.msk.f32.gmra.mxu0 %vm223_vm0, %v210_v35  ;;  %683 = vmatmul.mubr.msk.f32.gmra.mxu1 %vm223_vm0, %v218_v36 }
  0x19   :  { %153 = vadd.xlane.f32.xlu1 %v63_v37  ;;  %151 = vadd.xlane.f32.xlu0 %v62_v38 }
  0x1d   :  { %157 = vadd.xlane.f32.xlu1 %v65_v41  ;;  %155 = vadd.xlane.f32.xlu0 %v64_v42 }
  0x21   :  { %161 = vadd.xlane.f32.xlu1 %v67_v46  ;;  %159 = vadd.xlane.f32.xlu0 %v66_v47 }
  0x25   :  { %165 = vadd.xlane.f32.xlu1 %v69_v50  ;;  %163 = vadd.xlane.f32.xlu0 %v68_v51 }
  0x29   :  { %169 = vadd.xlane.f32.xlu1 %v71_v54  ;;  %167 = vadd.xlane.f32.xlu0 %v70_v55 }
  0x96   :  { %v144_v56 = vpop.xlane.xlu1 %143  ;;  %v140_v57 = vpop.xlane.xlu0 %139 }
  0x97   :  { %v173_v58 = vadd.f32 1.0, %v144_v56  ;;  %v171_v59 = vadd.f32 1.0, %v140_v57 }
  0x99   :  { %693 = vrsqrt.f32 %v173_v58 }
  0x9a   :  { %695 = vrsqrt.f32 %v171_v59  ;;  %v146_v60 = vpop.xlane.xlu1 %145  ;;  %v142_v61 = vpop.xlane.xlu0 %141 }
  0x9b   :  { %v174_v62 = vadd.f32 1.0, %v146_v60  ;;  %v172_v63 = vadd.f32 1.0, %v142_v61 }
  0x9d   :  { %697 = vrsqrt.f32 %v174_v62 }
  0x9e   :  { %699 = vrsqrt.f32 %v172_v63  ;;  %v150_v0 = vpop.xlane.xlu1 %149  ;;  %v148_v1 = vpop.xlane.xlu0 %147 }
  0x9f   :  { %v176_v2 = vadd.f32 1.0, %v150_v0  ;;  %v175_v3 = vadd.f32 1.0, %v148_v1 }
  0xa1   :  { %701 = vrsqrt.f32 %v176_v2 }
  0xa2   :  { %703 = vrsqrt.f32 %v175_v3  ;;  %v154_v4 = vpop.xlane.xlu1 %153  ;;  %v152_v5 = vpop.xlane.xlu0 %151 }
  0xa3   :  { %v178_v6 = vadd.f32 1.0, %v154_v4  ;;  %v177_v7 = vadd.f32 1.0, %v152_v5 }
  0xa5   :  { %705 = vrsqrt.f32 %v178_v6 }
  0xa6   :  { %v838_v8 = vpop.eup %693  ;;  %707 = vrsqrt.f32 %v177_v7  ;;  %v158_v9 = vpop.xlane.xlu1 %157 }
  0xa7   :  { %v156_v10 = vpop.xlane.xlu0 %155  ;;  %v696_v11 = vpop.eup %695  ;;  %516 = vst.msk [vmem:[%s953_s4 + $0x10] sm:$0xff] %vm513_vm1, %v838_v8  ;;  %v180_v12 = vadd.f32 1.0, %v158_v9 }
  0xa8   :  { %v179_v13 = vadd.f32 1.0, %v156_v10  ;;  %514 = vst.msk [vmem:[%s953_s4] sm:$0xff] %vm513_vm1, %v696_v11 }
  0xa9   :  { %709 = vrsqrt.f32 %v180_v12 }
  0xaa   :  { %v849_v14 = vpop.eup %697  ;;  %711 = vrsqrt.f32 %v179_v13  ;;  %v162_v15 = vpop.xlane.xlu1 %161 }
  0xab   :  { %v160_v16 = vpop.xlane.xlu0 %159  ;;  %v700_v17 = vpop.eup %699  ;;  %517 = vst.msk [vmem:[%s953_s4 + $0x18] sm:$0xff] %vm513_vm1, %v849_v14  ;;  %v182_v18 = vadd.f32 1.0, %v162_v15 }
  0xac   :  { %v181_v19 = vadd.f32 1.0, %v160_v16  ;;  %515 = vst.msk [vmem:[%s953_s4 + $0x8] sm:$0xff] %vm513_vm1, %v700_v17 }
  0xad   :  { %713 = vrsqrt.f32 %v182_v18 }
  0xae   :  { %v860_v20 = vpop.eup %701  ;;  %715 = vrsqrt.f32 %v181_v19  ;;  %v166_v21 = vpop.xlane.xlu1 %165 }
  0xaf   :  { %v164_v22 = vpop.xlane.xlu0 %163  ;;  %v862_v23 = vpop.eup %703  ;;  %519 = vst.msk [vmem:[%s953_s4 + $0x28] sm:$0xff] %vm513_vm1, %v860_v20  ;;  %v184_v24 = vadd.f32 1.0, %v166_v21 }
  0xb0   :  { %v183_v25 = vadd.f32 1.0, %v164_v22  ;;  %518 = vst.msk [vmem:[%s953_s4 + $0x20] sm:$0xff] %vm513_vm1, %v862_v23 }
  0xb1   :  { %717 = vrsqrt.f32 %v184_v24 }
  0xb2   :  { %v874_v26 = vpop.eup %705  ;;  %719 = vrsqrt.f32 %v183_v25  ;;  %v170_v27 = vpop.xlane.xlu1 %169 }
  0xb3   :  { %v168_v28 = vpop.xlane.xlu0 %167  ;;  %v876_v29 = vpop.eup %707  ;;  %521 = vst.msk [vmem:[%s953_s4 + $0x38] sm:$0xff] %vm513_vm1, %v874_v26  ;;  %v186_v30 = vadd.f32 1.0, %v170_v27 }
  0xb4   :  { %v185_v31 = vadd.f32 1.0, %v168_v28  ;;  %520 = vst.msk [vmem:[%s953_s4 + $0x30] sm:$0xff] %vm513_vm1, %v876_v29 }
  0xb5   :  { %721 = vrsqrt.f32 %v186_v30 }
  0xb6   :  { %v710_v32 = vpop.eup %709  ;;  %723 = vrsqrt.f32 %v185_v31 }
  0xb7   :  { %v712_v33 = vpop.eup %711  ;;  %523 = vst.msk [vmem:[%s953_s4 + $0x48] sm:$0xff] %vm513_vm1, %v710_v32 }
  0xb8   :  { %522 = vst.msk [vmem:[%s953_s4 + $0x40] sm:$0xff] %vm513_vm1, %v712_v33 }
  0xba   :  { %v714_v34 = vpop.eup %713 }
  0xbb   :  { %v716_v35 = vpop.eup %715  ;;  %525 = vst.msk [vmem:[%s953_s4 + $0x58] sm:$0xff] %vm513_vm1, %v714_v34 }
  0xbc   :  { %524 = vst.msk [vmem:[%s953_s4 + $0x50] sm:$0xff] %vm513_vm1, %v716_v35 }
  0xbe   :  { %v718_v36 = vpop.eup %717 }
  0xbf   :  { %v720_v37 = vpop.eup %719  ;;  %527 = vst.msk [vmem:[%s953_s4 + $0x68] sm:$0xff] %vm513_vm1, %v718_v36 }
  0xc0   :  { %526 = vst.msk [vmem:[%s953_s4 + $0x60] sm:$0xff] %vm513_vm1, %v720_v37 }
  0xc2   :  { %v722_v38 = vpop.eup %721 }
  0xc3   :  { %v724_v39 = vpop.eup %723  ;;  %529 = vst.msk [vmem:[%s953_s4 + $0x78] sm:$0xff] %vm513_vm1, %v722_v38 }
  0xc4   :  { %528 = vst.msk [vmem:[%s953_s4 + $0x70] sm:$0xff] %vm513_vm1, %v724_v39 }
  0xcb   :  { %v663_v40 = vpop.f32.mrf.mxu0  ;;  %v675_v41 = vpop.f32.mrf.mxu1 }
  0xcc   :  { %v418_v44 = vmul.f32 %v700_v17, %v663_v40  ;;  %v426_v45 = vmul.f32 %v710_v32, %v675_v41 }
  0xcd   :  { %v338_v42 = vpop.f32.mrf.mxu0  ;;  %v378_v43 = vpop.f32.mrf.mxu1 }
  0xce   :  { %v417_v46 = vmul.f32 %v696_v11, %v338_v42  ;;  %v425_v47 = vmul.f32 %v712_v33, %v378_v43 }
  0xcf   :  { %v666_v48 = vpop.f32.mrf.mxu0  ;;  %v678_v49 = vpop.f32.mrf.mxu1 }
  0xd0   :  { %v589_v50 = vpack.c.bf16 %v418_v44, %v417_v46  ;;  %v609_v51 = vpack.c.bf16 %v426_v45, %v425_v47  ;;  %v420_v54 = vmul.f32 %v849_v14, %v666_v48  ;;  %v428_v55 = vmul.f32 %v714_v34, %v678_v49 }
  0xd1   :  { %v348_v52 = vpop.f32.mrf.mxu0  ;;  %v388_v53 = vpop.f32.mrf.mxu1 }
  0xd2   :  { %590 = vst [vmem:[%s954_s3] sm:$0xff] %v589_v50   ;;  %629 = vst [vmem:[%s954_s3 + $0x20] sm:$0xff] %v609_v51   ;;  %v419_v56 = vmul.f32 %v838_v8, %v348_v52  ;;  %v427_v57 = vmul.f32 %v716_v35, %v388_v53 }
  0xd3   :  { %v669_v58 = vpop.f32.mrf.mxu0  ;;  %v681_v59 = vpop.f32.mrf.mxu1 }
  0xd4   :  { %v594_v60 = vpack.c.bf16 %v420_v54, %v419_v56  ;;  %v614_v61 = vpack.c.bf16 %v428_v55, %v427_v57  ;;  %v422_v0 = vmul.f32 %v860_v20, %v669_v58  ;;  %v430_v1 = vmul.f32 %v718_v36, %v681_v59 }
  0xd5   :  { %v358_v62 = vpop.f32.mrf.mxu0  ;;  %v398_v63 = vpop.f32.mrf.mxu1 }
  0xd6   :  { %626 = vst [vmem:[%s954_s3 + $0x8] sm:$0xff] %v594_v60   ;;  %630 = vst [vmem:[%s954_s3 + $0x28] sm:$0xff] %v614_v61   ;;  %v421_v2 = vmul.f32 %v862_v23, %v358_v62  ;;  %v429_v3 = vmul.f32 %v720_v37, %v398_v63 }
  0xd7   :  { %v672_v4 = vpop.f32.mrf.mxu0  ;;  %v684_v5 = vpop.f32.mrf.mxu1 }
  0xd8   :  { %v599_v6 = vpack.c.bf16 %v422_v0, %v421_v2  ;;  %v619_v7 = vpack.c.bf16 %v430_v1, %v429_v3  ;;  %v424_v10 = vmul.f32 %v874_v26, %v672_v4  ;;  %v432_v11 = vmul.f32 %v722_v38, %v684_v5 }
  0xd9   :  { %v368_v8 = vpop.f32.mrf.mxu0  ;;  %v408_v9 = vpop.f32.mrf.mxu1 }
  0xda   :  { %627 = vst [vmem:[%s954_s3 + $0x10] sm:$0xff] %v599_v6   ;;  %631 = vst [vmem:[%s954_s3 + $0x30] sm:$0xff] %v619_v7   ;;  %v423_v12 = vmul.f32 %v876_v29, %v368_v8  ;;  %v431_v13 = vmul.f32 %v724_v39, %v408_v9 }
  0xdc   :  { %v604_v14 = vpack.c.bf16 %v424_v10, %v423_v12  ;;  %v624_v15 = vpack.c.bf16 %v432_v11, %v431_v13 }
  0xde   :  { %628 = vst [vmem:[%s954_s3 + $0x18] sm:$0xff] %v604_v14   ;;  %632 = vst [vmem:[%s954_s3 + $0x38] sm:$0xff] %v624_v15  }

// kernel: graph_conv.3
= control target key start
LH: loop header
LB: loop body
LE: loop exit
PB: predicated region body
PF: predicated region fallthrough
CT: control target
= control target key end

     0   :  { %v608_v1 = vmov 0   ;;  %s827_s1 = inlined_call_operand.vmem [shape: bf16[128,128], index: 1, kind: input, shape index: {}]   ;;  %s828_s0 = inlined_call_operand.vmem [shape: s8[128,128], index: 0, kind: input, shape index: {}]   ;;  %s829_s2 = inlined_call_operand.vmem [shape: f32[128,1], index: 2, kind: input, shape index: {}]   ;;  %s830_s3 = inlined_call_operand.vmem [shape: f32[128,128], index: 3, kind: output, shape index: {}]  }
   0x1   :  { %v600_v0 = vld [vmem:[%s827_s1 + $0x38] sm:$0xff]   ;;  %599 = vset.pattern.permute.xlu1 %v608_v1  ;;  %598 = vset.pattern.permute.xlu0 %v608_v1  ;;  %v601_v2 = vld [vmem:[%s827_s1 + $0x30] sm:$0xff]   ;;  %v602_v3 = vld [vmem:[%s827_s1 + $0x28] sm:$0xff]  }
   0x2   :  { %548 = vmatprep.subr.bf16.mxu0 %v600_v0  ;;  %580 = vmatprep.subr.bf16.mxu1 %v600_v0  ;;  %v603_v4 = vld [vmem:[%s827_s1 + $0x20] sm:$0xff]   ;;  %v649_v6 = vld [vmem:[%s828_s0 + $0x10] sm:$0xff]  ;;  %v288_v11 = vld [vmem:[%s829_s2 + $0x18] sm:$0xff] }
   0x3   :  { %549 = vmatpush3.bf16.msra.mxu0 %v600_v0  ;;  %588 = vmatpush3.bf16.msra.mxu1 %v600_v0  ;;  %v644_v5 = vld [vmem:[%s828_s0] sm:$0xff]  ;;  %v43_v8 = vunpack.c.l.s8.bf16 %v649_v6  ;;  %v287_v9 = vld [vmem:[%s829_s2 + $0x10] sm:$0xff]  ;;  %v286_v12 = vld [vmem:[%s829_s2 + $0x8] sm:$0xff]  ;;  %v44_v28 = vunpack.c.h.s8.bf16 %v649_v6 }
   0x4   :  { %550 = vmatprep.subr.bf16.mxu0 %v601_v2  ;;  %581 = vmatprep.subr.bf16.mxu1 %v601_v2  ;;  %v39_v7 = vunpack.c.l.s8.bf16 %v644_v5  ;;  %v285_v10 = vld [vmem:[%s829_s2] sm:$0xff]  ;;  %v604_v13 = vld [vmem:[%s827_s1 + $0x18] sm:$0xff]   ;;  %v290_v14 = vld [vmem:[%s829_s2 + $0x28] sm:$0xff]  ;;  %v40_v27 = vunpack.c.h.s8.bf16 %v644_v5 }
   0x5   :  { %361 = vperm.xlu1 %599, %v287_v9   ;;  %351 = vperm.xlu0 %598, %v285_v10   ;;  %v289_v15 = vld [vmem:[%s829_s2 + $0x20] sm:$0xff]  ;;  %v605_v16 = vld [vmem:[%s827_s1 + $0x10] sm:$0xff]   ;;  %v292_v17 = vld [vmem:[%s829_s2 + $0x38] sm:$0xff] }
   0x6   :  { %564 = vmatprep.mubr.bf16.mxu0 %v39_v7  ;;  %572 = vmatprep.mubr.bf16.mxu1 %v43_v8  ;;  %v291_v18 = vld [vmem:[%s829_s2 + $0x30] sm:$0xff]  ;;  %v606_v19 = vld [vmem:[%s827_s1 + $0x8] sm:$0xff]   ;;  %v293_v21 = vld [vmem:[%s829_s2 + $0x40] sm:$0xff] }
   0x7   :  { %551 = vmatpush3.bf16.msra.mxu0 %v601_v2  ;;  %589 = vmatpush3.bf16.msra.mxu1 %v601_v2  ;;  %v294_v20 = vld [vmem:[%s829_s2 + $0x48] sm:$0xff]  ;;  %v607_v22 = vld [vmem:[%s827_s1] sm:$0xff]   ;;  %v296_v23 = vld [vmem:[%s829_s2 + $0x58] sm:$0xff] }
   0x8   :  { %552 = vmatprep.subr.bf16.mxu0 %v602_v3  ;;  %582 = vmatprep.subr.bf16.mxu1 %v602_v3  ;;  %v295_v24 = vld [vmem:[%s829_s2 + $0x50] sm:$0xff]  ;;  %v36_v25 = vld [vmem:[%s828_s0 + $0x8] sm:$0xff]  ;;  %v38_v26 = vld [vmem:[%s828_s0 + $0x18] sm:$0xff] }
   0x9   :  { %366 = vperm.xlu1 %599, %v288_v11   ;;  %356 = vperm.xlu0 %598, %v286_v12   ;;  %v41_v29 = vunpack.c.l.s8.bf16 %v36_v25  ;;  %v45_v30 = vunpack.c.l.s8.bf16 %v38_v26  ;;  %v298_v31 = vld [vmem:[%s829_s2 + $0x68] sm:$0xff]  ;;  %v297_v32 = vld [vmem:[%s829_s2 + $0x60] sm:$0xff]  ;;  %v300_v33 = vld [vmem:[%s829_s2 + $0x78] sm:$0xff]  ;;  %v42_v35 = vunpack.c.h.s8.bf16 %v36_v25  ;;  %v46_v36 = vunpack.c.h.s8.bf16 %v38_v26 }
   0xa   :  { %v299_v34 = vld [vmem:[%s829_s2 + $0x70] sm:$0xff]  ;;  %v525_v46 = vld [vmem:[%s827_s1 + $0x8] sm:$0xff]   ;;  %v494_v48 = vld [vmem:[%s827_s1] sm:$0xff]  }
   0xb   :  { %553 = vmatpush3.bf16.msra.mxu0 %v602_v3  ;;  %590 = vmatpush3.bf16.msra.mxu1 %v602_v3  ;;  %v529_v47 = vld [vmem:[%s827_s1 + $0x28] sm:$0xff]   ;;  %v528_v49 = vld [vmem:[%s827_s1 + $0x20] sm:$0xff]   ;;  %v499_v52 = vunpack.c.l.bf16 %v525_v46  ;;  %v748_v54 = vld [vmem:[%s827_s1 + $0x18] sm:$0xff]   ;;  %v495_v58 = vunpack.c.l.bf16 %v494_v48  ;;  %v500_v60 = vunpack.c.h.bf16 %v525_v46  ;;  %v496_v2 = vunpack.c.h.bf16 %v494_v48 }
   0xc   :  { %554 = vmatprep.subr.bf16.mxu0 %v603_v4  ;;  %583 = vmatprep.subr.bf16.mxu1 %v603_v4  ;;  %v515_v53 = vunpack.c.l.bf16 %v529_v47  ;;  %v753_v55 = vld [vmem:[%s827_s1 + $0x38] sm:$0xff]   ;;  %v511_v59 = vunpack.c.l.bf16 %v528_v49  ;;  %v516_v61 = vunpack.c.h.bf16 %v529_v47  ;;  %v758_v62 = vld [vmem:[%s827_s1 + $0x10] sm:$0xff]   ;;  %v512_v3 = vunpack.c.h.bf16 %v528_v49 }
   0xd   :  { %376 = vperm.xlu1 %599, %v290_v14   ;;  %371 = vperm.xlu0 %598, %v289_v15   ;;  %v763_v63 = vld [vmem:[%s827_s1 + $0x30] sm:$0xff]   ;;  %v523_v5 = vunpack.c.l.bf16 %v753_v55  ;;  %v503_v10 = vunpack.c.l.bf16 %v758_v62  ;;  %v508_v12 = vunpack.c.h.bf16 %v748_v54 }
   0xe   :  { %v519_v11 = vunpack.c.l.bf16 %v763_v63 }
   0xf   :  { %555 = vmatpush3.bf16.msra.mxu0 %v603_v4  ;;  %591 = vmatpush3.bf16.msra.mxu1 %v603_v4  ;;  %v507_v4 = vunpack.c.l.bf16 %v748_v54 }
  0x10   :  { %556 = vmatprep.subr.bf16.mxu0 %v604_v13  ;;  %584 = vmatprep.subr.bf16.mxu1 %v604_v13 }
  0x11   :  { %386 = vperm.xlu1 %599, %v292_v17   ;;  %381 = vperm.xlu0 %598, %v291_v18  }
  0x13   :  { %557 = vmatpush3.bf16.msra.mxu0 %v604_v13  ;;  %592 = vmatpush3.bf16.msra.mxu1 %v604_v13  ;;  %v524_v13 = vunpack.c.h.bf16 %v753_v55 }
  0x14   :  { %558 = vmatprep.subr.bf16.mxu0 %v605_v16  ;;  %585 = vmatprep.subr.bf16.mxu1 %v605_v16 }
  0x15   :  { %396 = vperm.xlu1 %599, %v294_v20   ;;  %391 = vperm.xlu0 %598, %v293_v21  }
  0x17   :  { %559 = vmatpush3.bf16.msra.mxu0 %v605_v16  ;;  %593 = vmatpush3.bf16.msra.mxu1 %v605_v16 }
  0x18   :  { %560 = vmatprep.subr.bf16.mxu0 %v606_v19  ;;  %586 = vmatprep.subr.bf16.mxu1 %v606_v19 }
  0x19   :  { %406 = vperm.xlu1 %599, %v296_v23   ;;  %401 = vperm.xlu0 %598, %v295_v24   ;;  %v520_v23 = vunpack.c.h.bf16 %v763_v63 }
  0x1b   :  { %561 = vmatpush3.bf16.msra.mxu0 %v606_v19  ;;  %594 = vmatpush3.bf16.msra.mxu1 %v606_v19 }
  0x1c   :  { %562 = vmatprep.subr.bf16.mxu0 %v607_v22  ;;  %587 = vmatprep.subr.bf16.mxu1 %v607_v22 }
  0x1d   :  { %416 = vperm.xlu1 %599, %v298_v31   ;;  %411 = vperm.xlu0 %598, %v297_v32  }
  0x1f   :  { %563 = vmatpush3.bf16.msra.mxu0 %v607_v22  ;;  %595 = vmatpush3.bf16.msra.mxu1 %v607_v22  ;;  %v504_v22 = vunpack.c.h.bf16 %v758_v62 }
  0x21   :  { %426 = vperm.xlu1 %599, %v300_v33   ;;  %421 = vperm.xlu0 %598, %v299_v34  }
  0x22   :  { %565 = vmatmul.mubr.bf16.vlgmr.msra.gmra.mxu0 %v40_v27  ;;  %573 = vmatmul.mubr.bf16.vlgmr.msra.gmra.mxu1 %v44_v28 }
  0x23   :  { %568 = vmatprep.mubr.bf16.mxu0 %v41_v29  ;;  %576 = vmatprep.mubr.bf16.mxu1 %v45_v30 }
  0x2a   :  { %569 = vmatmul.mubr.bf16.gmra.mxu0 %v42_v35  ;;  %577 = vmatmul.mubr.bf16.gmra.mxu1 %v46_v36 }
  0x80   :  { %v352_v37 = vpop.permute.xlu0 %351  ;;  %v362_v38 = vpop.permute.xlu1 %361 }
  0x84   :  { %v721_v39 = vpop.permute.xlu0 %356  ;;  %v367_v40 = vpop.permute.xlu1 %366 }
  0x88   :  { %v723_v41 = vpop.permute.xlu0 %371  ;;  %v725_v42 = vpop.permute.xlu1 %376 }
  0x8c   :  { %v727_v43 = vpop.permute.xlu0 %381  ;;  %v729_v44 = vpop.permute.xlu1 %386 }
  0x90   :  { %v392_v45 = vpop.permute.xlu0 %391  ;;  %v743_v50 = vpop.permute.xlu1 %396 }
  0x94   :  { %v402_v51 = vpop.permute.xlu0 %401  ;;  %v407_v14 = vpop.permute.xlu1 %406 }
  0x98   :  { %v412_v15 = vpop.permute.xlu0 %411  ;;  %v417_v46 = vpop.permute.xlu1 %416 }
  0x9c   :  { %v422_v47 = vpop.permute.xlu0 %421 }
  0xe2   :  { %v566_v56 = vpop.f32.mrf.mxu0  ;;  %v574_v57 = vpop.f32.mrf.mxu1 }
  0xe3   :  { %v335_v6 = vadd.f32 %v566_v56, %v499_v52  ;;  %v343_v7 = vadd.f32 %v574_v57, %v515_v53 }
  0xe4   :  { %v166_v0 = vpop.f32.mrf.mxu0  ;;  %v198_v1 = vpop.f32.mrf.mxu1 }
  0xe5   :  { %v431_v16 = vmul.f32 %v362_v38, %v335_v6  ;;  %v439_v17 = vmul.f32 %v402_v51, %v343_v7  ;;  %v333_v18 = vadd.f32 %v495_v58, %v166_v0  ;;  %v341_v19 = vadd.f32 %v511_v59, %v198_v1 }
  0xe6   :  { %v567_v8 = vpop.f32.mrf.mxu0  ;;  %v575_v9 = vpop.f32.mrf.mxu1 }
  0xe7   :  { %v447_v24 = vmax.f32 %v431_v16, 0.0  ;;  %v455_v25 = vmax.f32 %v439_v17, 0.0  ;;  %v429_v26 = vmul.f32 %v352_v37, %v333_v18  ;;  %v437_v27 = vmul.f32 %v392_v45, %v341_v19 }
  0xe8   :  { %v169_v20 = vpop.f32.mrf.mxu0  ;;  %v201_v21 = vpop.f32.mrf.mxu1  ;;  %v336_v28 = vadd.f32 %v567_v8, %v500_v60  ;;  %v344_v29 = vadd.f32 %v575_v9, %v516_v61 }
  0xe9   :  { %463 = vst [vmem:[%s830_s3 + $0x10] sm:$0xff] %v447_v24  ;;  %471 = vst [vmem:[%s830_s3 + $0x50] sm:$0xff] %v455_v25  ;;  %v445_v32 = vmax.f32 %v429_v26, 0.0  ;;  %v453_v33 = vmax.f32 %v437_v27, 0.0  ;;  %v334_v36 = vadd.f32 %v496_v2, %v169_v20  ;;  %v342_v38 = vadd.f32 %v512_v3, %v201_v21  ;;  %v427_v3 = vpop.permute.xlu1 %426 }
  0xea   :  { %v570_v30 = vpop.f32.mrf.mxu0  ;;  %v578_v31 = vpop.f32.mrf.mxu1  ;;  %v432_v34 = vmul.f32 %v367_v40, %v336_v28  ;;  %v440_v35 = vmul.f32 %v407_v14, %v344_v29 }
  0xeb   :  { %461 = vst [vmem:[%s830_s3] sm:$0xff] %v445_v32  ;;  %469 = vst [vmem:[%s830_s3 + $0x40] sm:$0xff] %v453_v33  ;;  %v339_v48 = vadd.f32 %v570_v30, %v507_v4  ;;  %v347_v49 = vadd.f32 %v578_v31, %v523_v5  ;;  %v430_v40 = vmul.f32 %v721_v39, %v334_v36 }
  0xec   :  { %v182_v37 = vpop.f32.mrf.mxu0  ;;  %v214_v45 = vpop.f32.mrf.mxu1  ;;  %v448_v51 = vmax.f32 %v432_v34, 0.0  ;;  %v456_v52 = vmax.f32 %v440_v35, 0.0  ;;  %v438_v53 = vmul.f32 %v743_v50, %v342_v38 }
  0xed   :  { %v435_v56 = vmul.f32 %v727_v43, %v339_v48  ;;  %v443_v57 = vmul.f32 %v422_v47, %v347_v49  ;;  %v337_v58 = vadd.f32 %v503_v10, %v182_v37  ;;  %v345_v59 = vadd.f32 %v519_v11, %v214_v45 }
  0xee   :  { %v571_v54 = vpop.f32.mrf.mxu0  ;;  %v579_v55 = vpop.f32.mrf.mxu1  ;;  %464 = vst [vmem:[%s830_s3 + $0x18] sm:$0xff] %v448_v51  ;;  %472 = vst [vmem:[%s830_s3 + $0x58] sm:$0xff] %v456_v52  ;;  %v446_v60 = vmax.f32 %v430_v40, 0.0  ;;  %v454_v61 = vmax.f32 %v438_v53, 0.0 }
  0xef   :  { %v451_v50 = vmax.f32 %v435_v56, 0.0  ;;  %v459_v63 = vmax.f32 %v443_v57, 0.0  ;;  %v433_v0 = vmul.f32 %v723_v41, %v337_v58  ;;  %v441_v43 = vmul.f32 %v412_v15, %v345_v59 }
  0xf0   :  { %v185_v39 = vpop.f32.mrf.mxu0  ;;  %v217_v62 = vpop.f32.mrf.mxu1  ;;  %462 = vst [vmem:[%s830_s3 + $0x8] sm:$0xff] %v446_v60  ;;  %470 = vst [vmem:[%s830_s3 + $0x48] sm:$0xff] %v454_v61  ;;  %v340_v1 = vadd.f32 %v571_v54, %v508_v12  ;;  %v348_v2 = vadd.f32 %v579_v55, %v524_v13 }
  0xf1   :  { %467 = vst [vmem:[%s830_s3 + $0x30] sm:$0xff] %v451_v50  ;;  %475 = vst [vmem:[%s830_s3 + $0x70] sm:$0xff] %v459_v63  ;;  %v449_v41 = vmax.f32 %v433_v0, 0.0  ;;  %v457_v4 = vmax.f32 %v441_v43, 0.0  ;;  %v338_v7 = vadd.f32 %v504_v22, %v185_v39  ;;  %v346_v8 = vadd.f32 %v520_v23, %v217_v62 }
  0xf2   :  { %v436_v5 = vmul.f32 %v729_v44, %v340_v1  ;;  %v444_v6 = vmul.f32 %v427_v3, %v348_v2 }
  0xf3   :  { %465 = vst [vmem:[%s830_s3 + $0x20] sm:$0xff] %v449_v41  ;;  %473 = vst [vmem:[%s830_s3 + $0x60] sm:$0xff] %v457_v4  ;;  %v434_v11 = vmul.f32 %v725_v42, %v338_v7  ;;  %v442_v12 = vmul.f32 %v417_v46, %v346_v8 }
  0xf4   :  { %v452_v9 = vmax.f32 %v436_v5, 0.0  ;;  %v460_v10 = vmax.f32 %v444_v6, 0.0 }
  0xf5   :  { %v450_v44 = vmax.f32 %v434_v11, 0.0  ;;  %v458_v13 = vmax.f32 %v442_v12, 0.0 }
  0xf6   :  { %468 = vst [vmem:[%s830_s3 + $0x38] sm:$0xff] %v452_v9  ;;  %476 = vst [vmem:[%s830_s3 + $0x78] sm:$0xff] %v460_v10 }
  0xf7   :  { %466 = vst [vmem:[%s830_s3 + $0x28] sm:$0xff] %v450_v44  ;;  %474 = vst [vmem:[%s830_s3 + $0x68] sm:$0xff] %v458_v13 }

</bundles_post_ra>
